<compile_context>
chip_gen: v5e
topology: v5e:2x2
jax: 0.10.0
libtpu: 0.0.40
codegen_flags: <defaults>
</compile_context>

<pallas_src>
import jax
import jax.numpy as jnp
from jax.experimental import pallas as pl
from jax.experimental.pallas import tpu as pltpu


# ----------------------------------------------------------------------------
# Kernel A: fused backbone (1x1 conv + ReLU), abs-diff, and 1x1-conv head.
# ----------------------------------------------------------------------------
def _fused_backbone_diff_head_kernel(x1_ref, x2_ref, w1_ref, b1_ref,
                                     wh_ref, bh_ref, o_ref):
    # x*_ref: [1, Cin, TS]          w1_ref: [hidden, Cin] (bf16)
    # b1_ref: [hidden, 1] (f32)     wh_ref: [ncls, hidden] (bf16)
    # bh_ref: [ncls, 1]  (f32)      o_ref : [1, ncls, TS]  (f32)
    w1 = w1_ref[...]
    wh = wh_ref[...]

    def feat(x_ref):
        x = x_ref[0].astype(jnp.bfloat16)                        # [Cin, TS]
        f = jnp.dot(w1, x, preferred_element_type=jnp.float32)   # [hidden, TS]
        return jnp.maximum(f + b1_ref[...], 0.0)                 # f32 elementwise

    d = jnp.abs(feat(x1_ref) - feat(x2_ref))                     # [hidden, TS]
    logits = jnp.dot(wh, d.astype(jnp.bfloat16),
                     preferred_element_type=jnp.float32) + bh_ref[...]
    o_ref[0] = logits.astype(o_ref.dtype)                        # [ncls, TS]


def fused_backbone_diff_head(x1_cs, x2_cs, params, *, block_s=512):
    """x*_cs: [B, Cin, S] f32  ->  logits [B, ncls, S] f32."""
    B, Cin, S = x1_cs.shape
    hidden = params["w1"].shape[1]
    ncls = params["wh"].shape[1]

    # Lane-dense spatial tile: a multiple of 128, or the full S when it is small.
    if S <= block_s:
        ts = S
    else:
        ts = max(128, (block_s // 128) * 128)
    grid = (B, pl.cdiv(S, ts))

    # Weights pre-cast to bf16 (MXU operands) and transposed so they multiply
    # channels-major activations without any in-kernel transposes.
    w1_t = params["w1"].T.astype(jnp.bfloat16)        # [hidden, Cin]
    wh_t = params["wh"].T.astype(jnp.bfloat16)        # [ncls, hidden]
    b1_c = params["b1"].reshape(hidden, 1)            # f32
    bh_c = params["bh"].reshape(ncls, 1)              # f32

    flops = int(B * S * (4 * Cin * hidden + 2 * hidden * ncls))
    bytes_accessed = int((2 * B * S * Cin + B * ncls * S) * 4
                         + (w1_t.size + wh_t.size) * 2
                         + (b1_c.size + bh_c.size) * 4)

    return pl.pallas_call(
        _fused_backbone_diff_head_kernel,
        out_shape=jax.ShapeDtypeStruct((B, ncls, S), jnp.float32),
        grid=grid,
        in_specs=[
            pl.BlockSpec((1, Cin, ts), lambda b, s: (b, 0, s)),
            pl.BlockSpec((1, Cin, ts), lambda b, s: (b, 0, s)),
            pl.BlockSpec((hidden, Cin), lambda b, s: (0, 0)),   # VMEM-resident
            pl.BlockSpec((hidden, 1), lambda b, s: (0, 0)),
            pl.BlockSpec((ncls, hidden), lambda b, s: (0, 0)),
            pl.BlockSpec((ncls, 1), lambda b, s: (0, 0)),
        ],
        out_specs=pl.BlockSpec((1, ncls, ts), lambda b, s: (b, 0, s)),
        compiler_params=pltpu.CompilerParams(
            dimension_semantics=("parallel", "parallel"),
            vmem_limit_bytes=32 * 1024 * 1024),
        cost_estimate=pl.CostEstimate(flops=flops, transcendentals=0,
                                      bytes_accessed=bytes_accessed),
    )(x1_cs, x2_cs, w1_t, b1_c, wh_t, bh_c)


# ----------------------------------------------------------------------------
# Kernel B: bilinear upsample (align_corners=True) as Rh @ X @ RwT per batch,
# all channels handled in a single grid step.
# ----------------------------------------------------------------------------
def _bilinear_upsample_kernel(rh_ref, rwT_ref, x_ref, o_ref):
    # rh: [H, H2]   rwT: [W2, W]   x: [1, C, H2, W2]   o: [1, C, H, W]
    rh = rh_ref[...]
    rwT = rwT_ref[...]
    ncls = x_ref.shape[1]
    for c in range(ncls):  # static unroll; number of classes/channels is tiny
        t = jnp.dot(rh, x_ref[0, c], preferred_element_type=jnp.float32)
        o_ref[0, c] = jnp.dot(t, rwT,
                              preferred_element_type=jnp.float32
                              ).astype(o_ref.dtype)


def _interp_matrix(dst, src):
    """Bilinear interpolation matrix with align_corners=True semantics."""
    if dst == 1:
        pos = jnp.zeros((1,), jnp.float32)
    else:
        pos = jnp.arange(dst, dtype=jnp.float32) * ((src - 1) / (dst - 1))
    i0 = jnp.clip(jnp.floor(pos), 0, src - 1).astype(jnp.int32)
    i1 = jnp.minimum(i0 + 1, src - 1)
    frac = pos - i0.astype(jnp.float32)
    return (jax.nn.one_hot(i0, src, dtype=jnp.float32) * (1.0 - frac)[:, None]
            + jax.nn.one_hot(i1, src, dtype=jnp.float32) * frac[:, None])


def bilinear_upsample_nchw(x, out_h, out_w):
    """x: [B, C, H2, W2] -> [B, C, out_h, out_w], bilinear, align_corners=True."""
    B, C, H2, W2 = x.shape
    rh = _interp_matrix(out_h, H2)          # [out_h, H2]
    rwT = _interp_matrix(out_w, W2).T       # [W2, out_w]
    return pl.pallas_call(
        _bilinear_upsample_kernel,
        out_shape=jax.ShapeDtypeStruct((B, C, out_h, out_w), jnp.float32),
        grid=(B,),                           # one step per batch element
        in_specs=[
            pl.BlockSpec((out_h, H2), lambda b: (0, 0)),
            pl.BlockSpec((W2, out_w), lambda b: (0, 0)),
            pl.BlockSpec((1, C, H2, W2), lambda b: (b, 0, 0, 0)),
        ],
        out_specs=pl.BlockSpec((1, C, out_h, out_w), lambda b: (b, 0, 0, 0)),
        compiler_params=pltpu.CompilerParams(
            dimension_semantics=("parallel",),
            vmem_limit_bytes=32 * 1024 * 1024),
    )(rh, rwT, x)


# ----------------------------------------------------------------------------
# BaseNet forward (Pallas-backed)
# ----------------------------------------------------------------------------
def init_params(key, cin, hidden, ncls):
    k1, k2, k3, k4 = jax.random.split(key, 4)
    return {
        "w1": jax.random.normal(k1, (cin, hidden), jnp.float32) * 0.1,
        "b1": jax.random.normal(k2, (hidden,), jnp.float32) * 0.1,
        "wh": jax.random.normal(k3, (hidden, ncls), jnp.float32) * 0.1,
        "bh": jax.random.normal(k4, (ncls,), jnp.float32) * 0.1,
    }


def base_forward(params, x1, x2, *, block_s=512):
    """x1, x2: NCHW [B, C, H, W]  ->  NCHW [B, ncls, H, W]."""
    B, C, H, W = x1.shape
    ncls = params["wh"].shape[1]

    # Synthetic backbone front-end: stride-2 subsample. Channels-major layout
    # means no NCHW->NHWC transpose is needed, just a free contiguous reshape.
    # TODO(synk): fold the stride-2 gather into the kernel DMA (pl.ANY + manual
    # strided copy) to remove this XLA pass on the mem-bound path.
    def prep(x):
        xs = x[:, :, ::2, ::2]                        # [B, C, H2, W2]
        return xs.reshape(B, C, -1), xs.shape[2], xs.shape[3]

    x1f, H2, W2 = prep(x1)
    x2f, _, _ = prep(x2)

    logits = fused_backbone_diff_head(x1f, x2f, params, block_s=block_s)
    logits = logits.reshape(B, ncls, H2, W2)          # free contiguous split
    # F.interpolate(..., mode='bilinear', align_corners=True)
    return bilinear_upsample_nchw(logits, H, W)


def forward(params, x1, x2, TTA=False, *, block_s=512):
    if not TTA:
        return base_forward(params, x1, x2, block_s=block_s)

    B = x1.shape[0]
    softmax = lambda o: jax.nn.softmax(o, axis=1)

    # Group A: identity, flip(H), flip(W), flip(H)+flip(W) -> one [4B] forward.
    a1 = jnp.concatenate([x1, jnp.flip(x1, 2), jnp.flip(x1, 3),
                          jnp.flip(jnp.flip(x1, 2), 3)], axis=0)
    a2 = jnp.concatenate([x2, jnp.flip(x2, 2), jnp.flip(x2, 3),
                          jnp.flip(jnp.flip(x2, 2), 3)], axis=0)
    oa = softmax(base_forward(params, a1, a2, block_s=block_s))
    o0, o1, o2, o5 = jnp.split(oa, 4, axis=0)
    out = o0 + jnp.flip(o1, 2) + jnp.flip(o2, 3) + jnp.flip(jnp.flip(o5, 3), 2)

    # Group B: the two transposed-spatial variants -> one [2B] forward.
    x1t = jnp.swapaxes(x1, 2, 3)
    x2t = jnp.swapaxes(x2, 2, 3)
    xb1 = jnp.concatenate([jnp.flip(x1t, 3),
                           jnp.swapaxes(jnp.flip(x1, 3), 2, 3)], axis=0)
    xb2 = jnp.concatenate([jnp.flip(x2t, 3),
                           jnp.swapaxes(jnp.flip(x2, 3), 2, 3)], axis=0)
    ob = softmax(base_forward(params, xb1, xb2, block_s=block_s))
    o3, o4 = jnp.split(ob, 2, axis=0)
    out = out + jnp.swapaxes(jnp.flip(o3, 3), 2, 3)
    out = out + jnp.flip(jnp.swapaxes(o4, 2, 3), 3)
    return out / 6.0


# ----------------------------------------------------------------------------
# Pure-JAX reference (same bf16 matmul-operand casts; f32 accumulation)
# ----------------------------------------------------------------------------
def ref_base_forward(params, x1, x2):
    w1b = params["w1"].astype(jnp.bfloat16)
    whb = params["wh"].astype(jnp.bfloat16)

    def backbone(x):
        xs = jnp.transpose(x[:, :, ::2, ::2], (0, 2, 3, 1))       # NHWC
        f = jnp.dot(xs.astype(jnp.bfloat16), w1b,
                    preferred_element_type=jnp.float32)
        return jnp.maximum(f + params["b1"], 0.0)

    d = jnp.abs(backbone(x1) - backbone(x2))
    logits = (jnp.dot(d.astype(jnp.bfloat16), whb,
                      preferred_element_type=jnp.float32)
              + params["bh"]).transpose(0, 3, 1, 2)               # NCHW
    H, W = x1.shape[2], x1.shape[3]
    H2, W2 = logits.shape[2], logits.shape[3]
    rh = _interp_matrix(H, H2)
    rw = _interp_matrix(W, W2)
    return jnp.einsum("hk,bckj,wj->bchw", rh, logits, rw,
                      precision=jax.lax.Precision.HIGHEST)


def ref_forward_tta(params, x1, x2):
    softmax = lambda o: jax.nn.softmax(o, axis=1)
    out = softmax(ref_base_forward(params, x1, x2))
    o = ref_base_forward(params, jnp.flip(x1, 2), jnp.flip(x2, 2))
    out = out + jnp.flip(softmax(o), 2)
    o = ref_base_forward(params, jnp.flip(x1, 3), jnp.flip(x2, 3))
    out = out + jnp.flip(softmax(o), 3)
    o = ref_base_forward(params, jnp.flip(jnp.swapaxes(x1, 2, 3), 3),
                         jnp.flip(jnp.swapaxes(x2, 2, 3), 3))
    out = out + jnp.swapaxes(jnp.flip(softmax(o), 3), 2, 3)
    o = ref_base_forward(params, jnp.swapaxes(jnp.flip(x1, 3), 2, 3),
                         jnp.swapaxes(jnp.flip(x2, 3), 2, 3))
    out = out + jnp.flip(jnp.swapaxes(softmax(o), 2, 3), 3)
    o = ref_base_forward(params, jnp.flip(jnp.flip(x1, 2), 3),
                         jnp.flip(jnp.flip(x2, 2), 3))
    out = out + jnp.flip(jnp.flip(softmax(o), 3), 2)
    return out / 6.0


# ----------------------------------------------------------------------------
if __name__ == "__main__":
    # Small demo shapes; spatial=32 so the fused kernel runs a >1-tile spatial
    # grid (S = 16*16 = 256, tile = 128 -> grid = (B, 2)).
    B, C, H, W = 2, 4, 32, 32
    hidden, ncls = 32, 2
    block_s = 128

    key = jax.random.PRNGKey(0)
    kp, kx1, kx2 = jax.random.split(key, 3)
    params = init_params(kp, C, hidden, ncls)
    x1 = jax.random.normal(kx1, (B, C, H, W), jnp.float32)
    x2 = jax.random.normal(kx2, (B, C, H, W), jnp.float32)

    fwd = jax.jit(lambda p, a, b: forward(p, a, b, TTA=False, block_s=block_s))
    fwd_tta = jax.jit(lambda p, a, b: forward(p, a, b, TTA=True, block_s=block_s))

    out = jax.block_until_ready(fwd(params, x1, x2))
    assert out.shape == (B, ncls, H, W), out.shape
    ref = jax.block_until_ready(ref_base_forward(params, x1, x2))
    assert jnp.allclose(out, ref, atol=5e-3, rtol=5e-3), \
        float(jnp.max(jnp.abs(out - ref)))

    out_tta = jax.block_until_ready(fwd_tta(params, x1, x2))
    assert out_tta.shape == (B, ncls, H, W), out_tta.shape
    ref_tta = jax.block_until_ready(ref_forward_tta(params, x1, x2))
    assert jnp.allclose(out_tta, ref_tta, atol=5e-3, rtol=5e-3), \
        float(jnp.max(jnp.abs(out_tta - ref_tta)))

    print("KERNEL_OK")
</pallas_src>

<mosaic_0001>
module attributes {stable_mosaic.version = 11 : i64} {
  func.func @_bilinear_upsample_kernel(%arg0: i32, %arg1: memref<32x16xf32, #tpu.memory_space<vmem>>, %arg2: memref<16x32xf32, #tpu.memory_space<vmem>>, %arg3: memref<1x2x16x16xf32, #tpu.memory_space<vmem>>, %arg4: memref<1x2x32x32xf32, #tpu.memory_space<vmem>>) attributes {dimension_semantics = [#tpu.dimension_semantics<parallel>], iteration_bounds = array<i64: 2>, scalar_prefetch = 0 : i64, scratch_operands = 0 : i64, tpu.core_type = #tpu.core_type<tc>, window_params = [{pipeline_mode = #tpu.pipeline_mode<synchronous>, transform_indices = @transform_0, window_bounds = array<i64: 32, 16>}, {pipeline_mode = #tpu.pipeline_mode<synchronous>, transform_indices = @transform_1, window_bounds = array<i64: 16, 32>}, {transform_indices = @transform_2, window_bounds = array<i64: 1, 2, 16, 16>}, {transform_indices = @transform_3, window_bounds = array<i64: 1, 2, 32, 32>}]} {
    %c0 = arith.constant 0 : index
    %c0_0 = arith.constant 0 : index
    %0 = vector.load %arg1[%c0, %c0_0] : memref<32x16xf32, #tpu.memory_space<vmem>>, vector<32x16xf32>
    %c0_1 = arith.constant 0 : index
    %c0_2 = arith.constant 0 : index
    %1 = vector.load %arg2[%c0_1, %c0_2] : memref<16x32xf32, #tpu.memory_space<vmem>>, vector<16x32xf32>
    %c0_3 = arith.constant 0 : index
    %c0_4 = arith.constant 0 : index
    %c0_5 = arith.constant 0 : index
    %c0_6 = arith.constant 0 : index
    %2 = vector.load %arg3[%c0_3, %c0_4, %c0_5, %c0_6] : memref<1x2x16x16xf32, #tpu.memory_space<vmem>>, vector<1x1x16x16xf32>
    %3 = vector.shape_cast %2 : vector<1x1x16x16xf32> to vector<16x16xf32>
    %cst = arith.constant dense<0.000000e+00> : vector<32x16xf32>
    %4 = tpu.matmul %0, %3, %cst {dimension_numbers = #tpu.dot_dimension_numbers<[1], [0], [0], [1], [0, 0, 1, 1], [], []>} : vector<32x16xf32>, vector<16x16xf32>, vector<32x16xf32> -> vector<32x16xf32>
    %cst_7 = arith.constant dense<0.000000e+00> : vector<32x32xf32>
    %5 = tpu.matmul %4, %1, %cst_7 {dimension_numbers = #tpu.dot_dimension_numbers<[1], [0], [0], [1], [0, 0, 1, 1], [], []>} : vector<32x16xf32>, vector<16x32xf32>, vector<32x32xf32> -> vector<32x32xf32>
    %c0_8 = arith.constant 0 : index
    %c0_9 = arith.constant 0 : index
    %c0_10 = arith.constant 0 : index
    %c0_11 = arith.constant 0 : index
    %6 = vector.load %arg4[%c0_8, %c0_9, %c0_10, %c0_11] : memref<1x2x32x32xf32, #tpu.memory_space<vmem>>, vector<1x1x32x32xf32>
    %7 = vector.shape_cast %6 : vector<1x1x32x32xf32> to vector<32x32xf32>
    %8 = vector.shape_cast %5 : vector<32x32xf32> to vector<1x1x32x32xf32>
    tpu.vector_store %arg4[%c0_8, %c0_9, %c0_10, %c0_11], %8 {strides = array<i32>} : memref<1x2x32x32xf32, #tpu.memory_space<vmem>>, vector<1x1x32x32xf32>,
    %c0_12 = arith.constant 0 : index
    %c1 = arith.constant 1 : index
    %c0_13 = arith.constant 0 : index
    %c0_14 = arith.constant 0 : index
    %9 = vector.load %arg3[%c0_12, %c1, %c0_13, %c0_14] : memref<1x2x16x16xf32, #tpu.memory_space<vmem>>, vector<1x1x16x16xf32>
    %10 = vector.shape_cast %9 : vector<1x1x16x16xf32> to vector<16x16xf32>
    %cst_15 = arith.constant dense<0.000000e+00> : vector<32x16xf32>
    %11 = tpu.matmul %0, %10, %cst_15 {dimension_numbers = #tpu.dot_dimension_numbers<[1], [0], [0], [1], [0, 0, 1, 1], [], []>} : vector<32x16xf32>, vector<16x16xf32>, vector<32x16xf32> -> vector<32x16xf32>
    %cst_16 = arith.constant dense<0.000000e+00> : vector<32x32xf32>
    %12 = tpu.matmul %11, %1, %cst_16 {dimension_numbers = #tpu.dot_dimension_numbers<[1], [0], [0], [1], [0, 0, 1, 1], [], []>} : vector<32x16xf32>, vector<16x32xf32>, vector<32x32xf32> -> vector<32x32xf32>
    %c0_17 = arith.constant 0 : index
    %c1_18 = arith.constant 1 : index
    %c0_19 = arith.constant 0 : index
    %c0_20 = arith.constant 0 : index
    %13 = vector.load %arg4[%c0_17, %c1_18, %c0_19, %c0_20] : memref<1x2x32x32xf32, #tpu.memory_space<vmem>>, vector<1x1x32x32xf32>
    %14 = vector.shape_cast %13 : vector<1x1x32x32xf32> to vector<32x32xf32>
    %15 = vector.shape_cast %12 : vector<32x32xf32> to vector<1x1x32x32xf32>
    tpu.vector_store %arg4[%c0_17, %c1_18, %c0_19, %c0_20], %15 {strides = array<i32>} : memref<1x2x32x32xf32, #tpu.memory_space<vmem>>, vector<1x1x32x32xf32>,
    return
  }
  func.func @transform_0(%arg0: i32) -> (i32, i32) {
    %c0_i32 = arith.constant 0 : i32
    %c0_i32_0 = arith.constant 0 : i32
    %c0_i32_1 = arith.constant 0 : i32
    return %c0_i32, %c0_i32_0 : i32, i32
  }
  func.func @transform_1(%arg0: i32) -> (i32, i32) {
    %c0_i32 = arith.constant 0 : i32
    %c0_i32_0 = arith.constant 0 : i32
    %c0_i32_1 = arith.constant 0 : i32
    return %c0_i32, %c0_i32_0 : i32, i32
  }
  func.func @transform_2(%arg0: i32) -> (i32, i32, i32, i32) {
    %c0_i32 = arith.constant 0 : i32
    %c0_i32_0 = arith.constant 0 : i32
    %c0_i32_1 = arith.constant 0 : i32
    %c0_i32_2 = arith.constant 0 : i32
    return %arg0, %c0_i32, %c0_i32_0, %c0_i32_1 : i32, i32, i32, i32
  }
  func.func @transform_3(%arg0: i32) -> (i32, i32, i32, i32) {
    %c0_i32 = arith.constant 0 : i32
    %c0_i32_0 = arith.constant 0 : i32
    %c0_i32_1 = arith.constant 0 : i32
    %c0_i32_2 = arith.constant 0 : i32
    return %arg0, %c0_i32, %c0_i32_0, %c0_i32_1 : i32, i32, i32, i32
  }
}

module attributes {stable_mosaic.version = 11 : i64} {
  func.func @_fused_backbone_diff_head_kernel(%arg0: i32, %arg1: i32, %arg2: memref<1x4x128xf32, #tpu.memory_space<vmem>>, %arg3: memref<1x4x128xf32, #tpu.memory_space<vmem>>, %arg4: memref<32x4xbf16, #tpu.memory_space<vmem>>, %arg5: memref<32x1xf32, #tpu.memory_space<vmem>>, %arg6: memref<2x32xbf16, #tpu.memory_space<vmem>>, %arg7: memref<2x1xf32, #tpu.memory_space<vmem>>, %arg8: memref<1x2x128xf32, #tpu.memory_space<vmem>>) attributes {dimension_semantics = [#tpu.dimension_semantics<parallel>, #tpu.dimension_semantics<parallel>], iteration_bounds = array<i64: 2, 2>, scalar_prefetch = 0 : i64, scratch_operands = 0 : i64, tpu.core_type = #tpu.core_type<tc>, window_params = [{transform_indices = @transform_0, window_bounds = array<i64: 1, 4, 128>}, {transform_indices = @transform_1, window_bounds = array<i64: 1, 4, 128>}, {pipeline_mode = #tpu.pipeline_mode<synchronous>, transform_indices = @transform_2, window_bounds = array<i64: 32, 4>}, {pipeline_mode = #tpu.pipeline_mode<synchronous>, transform_indices = @transform_3, window_bounds = array<i64: 32, 1>}, {pipeline_mode = #tpu.pipeline_mode<synchronous>, transform_indices = @transform_4, window_bounds = array<i64: 2, 32>}, {pipeline_mode = #tpu.pipeline_mode<synchronous>, transform_indices = @transform_5, window_bounds = array<i64: 2, 1>}, {transform_indices = @transform_6, window_bounds = array<i64: 1, 2, 128>}]} {
    %c0 = arith.constant 0 : index
    %c0_0 = arith.constant 0 : index
    %0 = vector.load %arg4[%c0, %c0_0] : memref<32x4xbf16, #tpu.memory_space<vmem>>, vector<32x4xbf16>
    %c0_1 = arith.constant 0 : index
    %c0_2 = arith.constant 0 : index
    %1 = vector.load %arg6[%c0_1, %c0_2] : memref<2x32xbf16, #tpu.memory_space<vmem>>, vector<2x32xbf16>
    %c0_3 = arith.constant 0 : index
    %c0_4 = arith.constant 0 : index
    %c0_5 = arith.constant 0 : index
    %2 = vector.load %arg2[%c0_3, %c0_4, %c0_5] : memref<1x4x128xf32, #tpu.memory_space<vmem>>, vector<1x4x128xf32>
    %3 = vector.shape_cast %2 : vector<1x4x128xf32> to vector<4x128xf32>
    %4 = arith.truncf %3 : vector<4x128xf32> to vector<4x128xbf16>
    %cst = arith.constant dense<0.000000e+00> : vector<32x128xf32>
    %5 = tpu.matmul %0, %4, %cst {dimension_numbers = #tpu.dot_dimension_numbers<[1], [0], [0], [1], [0, 0, 1, 1], [], []>} : vector<32x4xbf16>, vector<4x128xbf16>, vector<32x128xf32> -> vector<32x128xf32>
    %c0_6 = arith.constant 0 : index
    %c0_7 = arith.constant 0 : index
    %6 = vector.load %arg5[%c0_6, %c0_7] : memref<32x1xf32, #tpu.memory_space<vmem>>, vector<32x1xf32>
    %7 = vector.broadcast %6 : vector<32x1xf32> to vector<32x128xf32>
    %8 = arith.addf %5, %7 : vector<32x128xf32>
    %cst_8 = arith.constant 0.000000e+00 : f32
    %9 = vector.broadcast %cst_8 : f32 to vector<32x128xf32>
    %10 = arith.maximumf %8, %9 : vector<32x128xf32>
    %c0_9 = arith.constant 0 : index
    %c0_10 = arith.constant 0 : index
    %c0_11 = arith.constant 0 : index
    %11 = vector.load %arg3[%c0_9, %c0_10, %c0_11] : memref<1x4x128xf32, #tpu.memory_space<vmem>>, vector<1x4x128xf32>
    %12 = vector.shape_cast %11 : vector<1x4x128xf32> to vector<4x128xf32>
    %13 = arith.truncf %12 : vector<4x128xf32> to vector<4x128xbf16>
    %cst_12 = arith.constant dense<0.000000e+00> : vector<32x128xf32>
    %14 = tpu.matmul %0, %13, %cst_12 {dimension_numbers = #tpu.dot_dimension_numbers<[1], [0], [0], [1], [0, 0, 1, 1], [], []>} : vector<32x4xbf16>, vector<4x128xbf16>, vector<32x128xf32> -> vector<32x128xf32>
    %c0_13 = arith.constant 0 : index
    %c0_14 = arith.constant 0 : index
    %15 = vector.load %arg5[%c0_13, %c0_14] : memref<32x1xf32, #tpu.memory_space<vmem>>, vector<32x1xf32>
    %16 = vector.broadcast %15 : vector<32x1xf32> to vector<32x128xf32>
    %17 = arith.addf %14, %16 : vector<32x128xf32>
    %cst_15 = arith.constant 0.000000e+00 : f32
    %18 = vector.broadcast %cst_15 : f32 to vector<32x128xf32>
    %19 = arith.maximumf %17, %18 : vector<32x128xf32>
    %20 = arith.subf %10, %19 : vector<32x128xf32>
    %21 = math.absf %20 : vector<32x128xf32>
    %22 = arith.truncf %21 : vector<32x128xf32> to vector<32x128xbf16>
    %cst_16 = arith.constant dense<0.000000e+00> : vector<2x128xf32>
    %23 = tpu.matmul %1, %22, %cst_16 {dimension_numbers = #tpu.dot_dimension_numbers<[1], [0], [0], [1], [0, 0, 1, 1], [], []>} : vector<2x32xbf16>, vector<32x128xbf16>, vector<2x128xf32> -> vector<2x128xf32>
    %c0_17 = arith.constant 0 : index
    %c0_18 = arith.constant 0 : index
    %24 = vector.load %arg7[%c0_17, %c0_18] : memref<2x1xf32, #tpu.memory_space<vmem>>, vector<2x1xf32>
    %25 = vector.broadcast %24 : vector<2x1xf32> to vector<2x128xf32>
    %26 = arith.addf %23, %25 : vector<2x128xf32>
    %c0_19 = arith.constant 0 : index
    %c0_20 = arith.constant 0 : index
    %c0_21 = arith.constant 0 : index
    %27 = vector.load %arg8[%c0_19, %c0_20, %c0_21] : memref<1x2x128xf32, #tpu.memory_space<vmem>>, vector<1x2x128xf32>
    %28 = vector.shape_cast %27 : vector<1x2x128xf32> to vector<2x128xf32>
    %29 = vector.shape_cast %26 : vector<2x128xf32> to vector<1x2x128xf32>
    tpu.vector_store %arg8[%c0_19, %c0_20, %c0_21], %29 {strides = array<i32>} : memref<1x2x128xf32, #tpu.memory_space<vmem>>, vector<1x2x128xf32>,
    return
  }
  func.func @transform_0(%arg0: i32, %arg1: i32) -> (i32, i32, i32) {
    %c0_i32 = arith.constant 0 : i32
    %c0_i32_0 = arith.constant 0 : i32
    return %arg0, %c0_i32, %arg1 : i32, i32, i32
  }
  func.func @transform_1(%arg0: i32, %arg1: i32) -> (i32, i32, i32) {
    %c0_i32 = arith.constant 0 : i32
    %c0_i32_0 = arith.constant 0 : i32
    return %arg0, %c0_i32, %arg1 : i32, i32, i32
  }
  func.func @transform_2(%arg0: i32, %arg1: i32) -> (i32, i32) {
    %c0_i32 = arith.constant 0 : i32
    %c0_i32_0 = arith.constant 0 : i32
    %c0_i32_1 = arith.constant 0 : i32
    return %c0_i32, %c0_i32_0 : i32, i32
  }
  func.func @transform_3(%arg0: i32, %arg1: i32) -> (i32, i32) {
    %c0_i32 = arith.constant 0 : i32
    %c0_i32_0 = arith.constant 0 : i32
    %c0_i32_1 = arith.constant 0 : i32
    return %c0_i32, %c0_i32_0 : i32, i32
  }
  func.func @transform_4(%arg0: i32, %arg1: i32) -> (i32, i32) {
    %c0_i32 = arith.constant 0 : i32
    %c0_i32_0 = arith.constant 0 : i32
    %c0_i32_1 = arith.constant 0 : i32
    return %c0_i32, %c0_i32_0 : i32, i32
  }
  func.func @transform_5(%arg0: i32, %arg1: i32) -> (i32, i32) {
    %c0_i32 = arith.constant 0 : i32
    %c0_i32_0 = arith.constant 0 : i32
    %c0_i32_1 = arith.constant 0 : i32
    return %c0_i32, %c0_i32_0 : i32, i32
  }
  func.func @transform_6(%arg0: i32, %arg1: i32) -> (i32, i32, i32) {
    %c0_i32 = arith.constant 0 : i32
    %c0_i32_0 = arith.constant 0 : i32
    return %arg0, %c0_i32, %arg1 : i32, i32, i32
  }
}

</mosaic_0001>

<bundles_post_ra>
// kernel: _lambda_.3
= control target key start
LH: loop header
LB: loop body
LE: loop exit
PB: predicated region body
PF: predicated region fallthrough
CT: control target
= control target key end

     0   :  { %8 = vsyncpa [#allocation3], 0  ;;  %s711_s0 = inlined_call_operand.vmem [shape: f32[32,16], index: 0, kind: input, shape index: {}]   ;;  %s712_s1 = inlined_call_operand.vmem [shape: f32[16,32], index: 1, kind: input, shape index: {}]   ;;  %s713_s2 = inlined_call_operand.vmem [shape: f32[2,2,16,16], index: 2, kind: input, shape index: {}]   ;;  %s714_s3 = inlined_call_operand.hbm [shape: f32[2,2,32,32], index: 3, kind: output, shape index: {}]  }
   0x1   :  { %10 = vsyncpa [#allocation3 + $0x1], 0  ;;  %s584_s12 = smov 0   ;;  %s586_s13 = smov 0  }
   0x2   :  { %s588_s14 = smov 0   ;;  %s590_s15 = smov 0  }
   0x3 LB: > { %s605_s16 = sadd.s32 4294967295, %s560_s15   ;;  %s421_s17 = sadd.s32 4294967294, %s560_s15   ;;  %s560_s15 = sphi %s590_s15, %s720_s15   ;;  %s556_s14 = sphi %s588_s14, %s719_s14   ;;  %s552_s13 = sphi %s586_s13, %s718_s13   ;;  %s548_s12 = sphi %s584_s12, %s717_s12  }
   0x4   : > { %s609_s18 = sadd.s32 1, %s560_s15   ;;  %s91_s19 = sadd.s32 1, %s556_s14 }
   0x5   : > { %s88_s20 = ssub.s32 %s560_s15, %s609_s18  ;;  %p101_p0 = scmp.ne.s32.totalorder %s556_s14, %s552_s13 }
   0x6   : > { %p89_p1 = scmp.eq.s32.totalorder %s88_s20, 0  ;;  %p102_p2 = scmp.eq.s32.totalorder %s605_s16, 1 }
   0x7   : > { %p107_p3 = scmp.ne.s32.totalorder %s552_s13, %s548_s12  ;;  %p108_p4 = scmp.eq.s32.totalorder %s421_s17, 1 }
   0x8   : > { %s620_s21 = scalar_select %p89_p1, %s556_s14, %s91_s19  }
   0x9   : > { %p622_p5 = por %p102_p2, %p101_p0  ;;  %p626_p6 = por %p108_p4, %p107_p3 }
   0xa   : > { %p424_p7 = scmp.ge.s32.totalorder %s560_s15, 1  ;;  %p140_p8 = scmp.lt.s32.totalorder %s560_s15, 3 }
   0xc   : > { %p141_p9 = pnand %p424_p7, %p140_p8 }
   0xd   : > { %p164_p10 = scmp.lt.s32.totalorder (!%p141_p9), %s605_s16, 1  ;;  %s161_s20 = sand.u32 (!%p141_p9), 1, %s552_s13  }
   0xe   : > { %144 = sbr.rel (%p141_p9) target bundleno = 319 (0x13f), region = 32  ;;  %s456_s26 = sshll.u32 (!%p141_p9), %s605_s16, 6 }
   0xf   : > { %s355_s29 = scalar_lea.hbm (!%p141_p9), %s714_s3, %s456_s26  ;;  %s344_s5 = scalar_lea.sflag (!%p141_p9), [#allocation3], %s161_s20 }
  0x10   : > { %s358_s4 = sshll.u32 (!%p141_p9), %s355_s29, 4  ;;  %s518_s9 = scalar_lea.hbm (!%p141_p9), %s714_s3, 128  ;;  %s359_s4 = int_to_ptr.hbm [resolvable:$true] %s358_s4 }
  0x11   : > { %s512_s6 = sshra.s32 (!%p141_p9), %s359_s4, 4  ;;  %s513_s6 = int_to_ptr.hbm [resolvable:$true] %s512_s6 }
  0x12   : > { %s514_s7 = scalar_lea.hbm (!%p141_p9), %s513_s6, 64  ;;  %p519_p0 = scmp.lt.s32.totalorder (!%p141_p9), %s513_s6, %s714_s3 }
  0x13   : > { %s165_s24 = scalar_select %p164_p10, %s605_s16, 1  ;;  %v174_v0 = vld [vmem:[%s712_s1 + $0x8] sm:$0xff]  ;;  %v169_v4 = vld [vmem:[%s711_s0] sm:$0xff]  ;;  %vm177_vm0 = vcmask 130048   ;;  %v171_v7 = vld [vmem:[%s711_s0 + $0x10] sm:$0xff]  ;;  %vm260_vm1 = vcmask 261120  }
  0x14   : > { %323 = vmatpush.msra.mxu3 %v174_v0  ;;  %245 = vmatpush.msra.mxu1 %v174_v0  ;;  %v170_v6 = vld [vmem:[%s711_s0 + $0x8] sm:$0xff]  ;;  %v172_v8 = vld [vmem:[%s711_s0 + $0x18] sm:$0xff]  ;;  %v173_v9 = vld [vmem:[%s712_s1] sm:$0xff]  ;;  %p515_p11 = scmp.ne.s32.totalorder %s513_s6, %s514_s7  ;;  %p520_p1 = scmp.lt.s32.totalorder %s518_s9, %s514_s7 }
  0x15   : > { %s455_s27 = sshll.u32 %s165_s24, 5  ;;  %s425_s24 = sshll.u32 %s161_s20, 6 }
  0x16   : > { %s168_s30 = scalar_lea.vmem %s713_s2, %s455_s27  ;;  %324 = vmatpush.msra.mxu3 %v173_v9  ;;  %246 = vmatpush.msra.mxu1 %v173_v9  ;;  %s163_s25 = scalar_lea.vmem [#allocation2], %s425_s24 }
  0x17   : > { %v437_v1 = vld [vmem:[%s168_s30 + $0x18] sm:$0xff]  ;;  %v436_v2 = vld [vmem:[%s168_s30 + $0x10] sm:$0xff]  ;;  %v176_v3 = vld [vmem:[%s168_s30 + $0x8] sm:$0xff]  ;;  %p516_p12 = pnand %p515_p11, %p622_p5  ;;  %p521_p2 = por %p520_p1, %p519_p0 }
  0x18   : > { %282 = vmatpush.msra.mxu2 %v437_v1  ;;  %204 = vmatpush.msra.mxu0 %v176_v3  ;;  %v175_v5 = vld [vmem:[%s168_s30] sm:$0xff]  ;;  %s356_s30 = sshll.u32 %s163_s25, 4  ;;  %s357_s30 = int_to_ptr.vmem [resolvable:$true] %s356_s30 }
  0x19   : > { %p517_p13 = pneg %p516_p12 }
  0x1a   : > { %283 = vmatpush.msra.mxu2 %v436_v2  ;;  %205 = vmatpush.msra.mxu0 %v175_v5 }
  0x1b   : > { %438 = vmatmul.msk.f32.vlgmr.msra.gmra.mxu2 %vm177_vm0, %v169_v4  ;;  %428 = vmatmul.msk.f32.vlgmr.msra.gmra.mxu0 %vm177_vm0, %v169_v4  ;;  %p522_p3 = pnand %p521_p2, %p517_p13 }
  0x23   : > { %439 = vmatmul.msk.f32.gmra.mxu2 %vm177_vm0, %v170_v6  ;;  %429 = vmatmul.msk.f32.gmra.mxu0 %vm177_vm0, %v170_v6 }
  0x2b   : > { %440 = vmatmul.msk.f32.gmra.mxu2 %vm177_vm0, %v171_v7  ;;  %430 = vmatmul.msk.f32.gmra.mxu0 %vm177_vm0, %v171_v7 }
  0x33   : > { %441 = vmatmul.msk.f32.gmra.mxu2 %vm177_vm0, %v172_v8  ;;  %431 = vmatmul.msk.f32.gmra.mxu0 %vm177_vm0, %v172_v8 }
  0x98   : > { %v207_v10 = vpop.f32.mrf.mxu0 }
  0x99   : > { %432 = vmatmul.msk.f32.vlgmr.msra.gmra.mxu1 %vm177_vm0, %v207_v10 }
  0x9e   : > { %v285_v11 = vpop.f32.mrf.mxu2 }
  0x9f   : > { %442 = vmatmul.msk.f32.vlgmr.msra.gmra.mxu3 %vm177_vm0, %v285_v11 }
  0xa0   : > { %v210_v12 = vpop.f32.mrf.mxu0 }
  0xa1   : > { %433 = vmatmul.msk.f32.gmra.mxu1 %vm177_vm0, %v210_v12 }
  0xa6   : > { %v288_v13 = vpop.f32.mrf.mxu2 }
  0xa7   : > { %443 = vmatmul.msk.f32.gmra.mxu3 %vm177_vm0, %v288_v13 }
  0xa8   : > { %v213_v14 = vpop.f32.mrf.mxu0 }
  0xa9   : > { %434 = vmatmul.msk.f32.gmra.mxu1 %vm177_vm0, %v213_v14 }
  0xae   : > { %v291_v15 = vpop.f32.mrf.mxu2 }
  0xaf   : > { %444 = vmatmul.msk.f32.gmra.mxu3 %vm177_vm0, %v291_v15 }
  0xb0   : > { %v216_v16 = vpop.f32.mrf.mxu0 }
  0xb1   : > { %435 = vmatmul.msk.f32.gmra.mxu1 %vm177_vm0, %v216_v16 }
  0xb6   : > { %v294_v17 = vpop.f32.mrf.mxu2 }
  0xb7   : > { %445 = vmatmul.msk.f32.gmra.mxu3 %vm177_vm0, %v294_v17 }
 0x116   : > { %v248_v18 = vpop.f32.mrf.mxu1 }
 0x117   : > { %261 = vst.msk [vmem:[%s163_s25] sm:$0xff] %vm260_vm1, %v248_v18 }
 0x11e   : > { %v251_v19 = vpop.f32.mrf.mxu1 }
 0x11f   : > { %262 = vst.msk [vmem:[%s163_s25 + $0x8] sm:$0xff] %vm260_vm1, %v251_v19 }
 0x122   : > { %v326_v20 = vpop.f32.mrf.mxu3 }
 0x123   : > { %446 = vst.msk [vmem:[%s163_s25 + $0x20] sm:$0xff] %vm260_vm1, %v326_v20 }
 0x126   : > { %v254_v21 = vpop.f32.mrf.mxu1 }
 0x127   : > { %263 = vst.msk [vmem:[%s163_s25 + $0x10] sm:$0xff] %vm260_vm1, %v254_v21 }
 0x12a   : > { %v329_v22 = vpop.f32.mrf.mxu3 }
 0x12b   : > { %447 = vst.msk [vmem:[%s163_s25 + $0x28] sm:$0xff] %vm260_vm1, %v329_v22 }
 0x12e   : > { %v257_v23 = vpop.f32.mrf.mxu1 }
 0x12f   : > { %264 = vst.msk [vmem:[%s163_s25 + $0x18] sm:$0xff] %vm260_vm1, %v257_v23 }
 0x132   : > { %v332_v24 = vpop.f32.mrf.mxu3 }
 0x133   : > { %448 = vst.msk [vmem:[%s163_s25 + $0x30] sm:$0xff] %vm260_vm1, %v332_v24 }
 0x13a   : > { %v335_v25 = vpop.f32.mrf.mxu3 }
 0x13b   : > { %449 = vst.msk [vmem:[%s163_s25 + $0x38] sm:$0xff] %vm260_vm1, %v335_v25 }
 0x13c   : > { %525 = shalt.err (!%p522_p3)
}
 0x13d   : > { %s562_s17 = smov 128   ;;  %s563_s19 = smov 8  }
 0x13e   : > { %457 = dma.vmem_to_hbm [thread:$0]  (%p622_p5), %s357_s30, 1024, %s359_s4, %s344_s5, %s562_s17, %s562_s17, %s563_s19  }
 0x13f PF: > { %p463_p4 = scmp.ge.s32.totalorder %s560_s15, 2  ;;  %s373_s20 = sand.u32 1, %s548_s12  }
 0x140   : > { %s374_s24 = scalar_lea.sflag [#allocation3], %s373_s20 }
 0x141   : > { %p460_p7 = pnand %p463_p4, %p626_p6 }
 0x143   : > { %p461_p8 = pneg %p460_p7 }
 0x145   : > { %543 = dma.done.wait (%p461_p8), %s374_s24, 1024  }
 0x146   : > { %545 = vsyncadd (%p461_p8), %s374_s24, 4294966272  ;;  %p13_p9 = scmp.ge.s32.totalorder %s609_s18, 4   ;;  %s717_s12 = smov %s552_s13 }
 0x147   : > { %s718_s13 = smov %s556_s14  ;;  %s719_s14 = smov %s620_s21 }
 0x148   : > { %s720_s15 = smov %s609_s18  ;;  %15 = sbr.rel (!%p13_p9) target bundleno = 3 (0x3), region = 69 }
 0x14d   :  { %380 = vsyncpa [#allocation3], 1 }
 0x14e   :  { %382 = vsyncpa [#allocation3 + $0x1], 1 }

// kernel: _lambda_.2
= control target key start
LH: loop header
LB: loop body
LE: loop exit
PB: predicated region body
PF: predicated region fallthrough
CT: control target
= control target key end

     0   :  { %s705_s21 = smov 0   ;;  %s707_s22 = smov 0   ;;  %s787_s0 = inlined_call_operand.vmem [shape: f32[2,4,256], index: 0, kind: input, shape index: {}]   ;;  %s788_s1 = inlined_call_operand.vmem [shape: f32[2,4,256], index: 1, kind: input, shape index: {}]   ;;  %s789_s2 = inlined_call_operand.vmem [shape: bf16[32,4], index: 2, kind: input, shape index: {}]   ;;  %s790_s3 = inlined_call_operand.vmem [shape: f32[32,1], index: 3, kind: input, shape index: {}]   ;;  %s791_s4 = inlined_call_operand.vmem [shape: bf16[2,32], index: 4, kind: input, shape index: {}]   ;;  %s792_s5 = inlined_call_operand.vmem [shape: f32[2,1], index: 5, kind: input, shape index: {}]   ;;  %s793_s6 = inlined_call_operand.vmem [shape: f32[2,2,256], index: 6, kind: output, shape index: {}]  }
   0x1   :  { %s709_s23 = smov 0   ;;  %s711_s24 = smov 0  }
   0x2   :  { %s713_s25 = smov 0  }
   0x3 LB: > { %s25_s26 = sadd.s32 1, %s659_s23  ;;  %s28_s27 = sadd.s32 1, %s663_s24  ;;  %s667_s25 = sphi %s713_s25, %s16_s25   ;;  %s663_s24 = sphi %s711_s24, %s797_s24   ;;  %s659_s23 = sphi %s709_s23, %s796_s23   ;;  %s655_s22 = sphi %s707_s22, %s795_s22   ;;  %s651_s21 = sphi %s705_s21, %s794_s21  }
   0x4   : > { %p26_p0 = scmp.ge.s32.totalorder %s25_s26, 2  ;;  %p560_p1 = scmp.ge.s32.totalorder %s667_s25, 1 }
   0x5   : > { %p246_p2 = scmp.lt.s32.totalorder %s667_s25, 5 }
   0x6   : > { %s799_s26 = smov (%p26_p0, %s25_s26), 0  ;;  %s801_s27 = smov (!%p26_p0, %s28_s27), %s663_s24 }
   0x7   : > { %p247_p3 = pnand %p560_p1, %p246_p2  ;;  %p30_p4 = scmp.ge.s32.totalorder %s801_s27, 2 }
   0x8   : > { %p290_p5 = scmp.lt.s32.totalorder (!%p247_p3), %s655_s22, 1  ;;  %p292_p6 = scmp.lt.s32.totalorder (!%p247_p3), %s651_s21, 1 }
   0x9   : > { %s803_s27 = smov (%p30_p4, %s801_s27), 0  ;;  %250 = sbr.rel (%p247_p3) target bundleno = 335 (0x14f), region = 44 }
   0xe   : > { %v322_v0 = vld [vmem:[%s790_s3] sm:$0xff]  ;;  %v324_v1 = vld [vmem:[%s790_s3 + $0x10] sm:$0xff]  ;;  %s805_s22 = smov (!%p290_p5, %s655_s22), 1  ;;  %v669_v2 = vmov 0   ;;  %s807_s21 = smov (!%p292_p6, %s651_s21), 1  ;;  %v323_v3 = vld [vmem:[%s790_s3 + $0x8] sm:$0xff] }
   0xf   : > { %627 = vset.pattern.permute.xlu1 %v669_v2  ;;  %626 = vset.pattern.permute.xlu0 %v669_v2  ;;  %s561_s8 = sshll.u32 %s805_s22, 1  ;;  %vm363_vm0 = vcmask 1041408   ;;  %v325_v6 = vld [vmem:[%s790_s3 + $0x18] sm:$0xff]  ;;  %v582_v11 = vld [vmem:[%s789_s2] sm:$0xff]  ;;  %vm356_vm1 = vcmask 31744   ;;  %v583_v12 = vld [vmem:[%s789_s2 + $0x8] sm:$0xff] }
  0x10   : > { %328 = vperm.xlu1 %627, %v322_v0   ;;  %338 = vperm.xlu0 %626, %v324_v1   ;;  %s741_s9 = sadd.s32 %s561_s8, %s807_s21  ;;  %v428_v19 = vld [vmem:[%s792_s5] sm:$0x3]  ;;  %vm434_vm2 = vcmask 261120  }
  0x11   : > { %628 = vset.pattern.permute.xlu2 %v669_v2  ;;  %s562_s10 = sshll.u32 %s741_s9, 2  ;;  %v319_v52 = vld [vmem:[%s791_s4] sm:$0x1]  ;;  %s566_s11 = sshll.u32 %s741_s9, 1 }
  0x12   : > { %s297_s13 = scalar_lea.vmem %s787_s0, %s562_s10  ;;  %s305_s16 = scalar_lea.vmem %s788_s1, %s562_s10  ;;  %431 = vperm.xlu2 %628, %v428_v19  }
  0x13   : > { %v320_v4 = vld [vmem:[%s297_s13] sm:$0xf]  ;;  %s313_s14 = scalar_lea.vmem %s793_s6, %s566_s11 }
  0x14   : > { %v390_v5 = vld [vmem:[%s305_s16] sm:$0xf]  ;;  %v321_v7 = vpack.c.bf16 %v320_v4, %v320_v4 }
  0x15   : > { %v391_v8 = vpack.c.bf16 %v390_v5, %v390_v5 }
  0x16   : > { %v365_v9 = vsel %vm363_vm0, %v321_v7, 0 }
  0x17   : > { %v393_v10 = vsel %vm363_vm0, %v391_v8, 0  ;;  %374 = vmatpush.bf16.msra.mxu0 %v365_v9  ;;  %584 = vmatpush.bf16.msra.mxu3 %v365_v9 }
  0x18   : > { %333 = vperm.xlu1 %627, %v323_v3   ;;  %343 = vperm.xlu0 %626, %v325_v6  }
  0x19   : > { %402 = vmatpush.bf16.msra.mxu1 %v393_v10 }
  0x1a   : > { %575 = vmatmul.msk.bf16.vlgmr.msra.gmra.mxu0 %vm356_vm1, %v582_v11  ;;  %576 = vmatmul.msk.bf16.vlgmr.msra.gmra.mxu3 %vm356_vm1, %v583_v12 }
  0x1c   : > { %577 = vmatmul.msk.bf16.vlgmr.msra.gmra.mxu1 %vm356_vm1, %v582_v11 }
  0x2c   : > { %578 = vmatmul.msk.bf16.gmra.mxu1 %vm356_vm1, %v583_v12 }
  0x6c   : > { %v432_v53 = vpop.permute.xlu2 %431 }
  0x82   : > { %v329_v14 = vpop.permute.xlu1 %328  ;;  %v339_v17 = vpop.permute.xlu0 %338 }
  0x8a   : > { %v334_v21 = vpop.permute.xlu1 %333  ;;  %v344_v25 = vpop.permute.xlu0 %343 }
  0x97   : > { %v376_v15 = vpop.f32.mrf.mxu0 }
  0x98   : > { %v377_v29 = vadd.f32 %v376_v15, %v329_v14 }
  0x99   : > { %v404_v13 = vpop.f32.mrf.mxu1 }
  0x9a   : > { %v405_v30 = vadd.f32 %v404_v13, %v329_v14  ;;  %v386_v38 = vmax.f32 %v377_v29, 0.0 }
  0x9c   : > { %v414_v39 = vmax.f32 %v405_v30, 0.0 }
  0x9d   : > { %v381_v18 = vpop.f32.mrf.mxu3 }
  0x9e   : > { %v382_v23 = vadd.f32 %v381_v18, %v339_v17  ;;  %v418_v45 = vsub.f32 %v386_v38, %v414_v39 }
  0x9f   : > { %v378_v22 = vpop.f32.mrf.mxu0 }
  0xa0   : > { %v379_v27 = vadd.f32 %v378_v22, %v334_v21  ;;  %v388_v31 = vmax.f32 %v382_v23, 0.0  ;;  %v422_v50 = vand.u32 2147483647, %v418_v45 }
  0xa1   : > { %v406_v16 = vpop.f32.mrf.mxu1 }
  0xa2   : > { %v407_v28 = vadd.f32 %v406_v16, %v334_v21  ;;  %v387_v35 = vmax.f32 %v379_v27, 0.0 }
  0xa4   : > { %v415_v36 = vmax.f32 %v407_v28, 0.0 }
  0xa5   : > { %v383_v26 = vpop.f32.mrf.mxu3 }
  0xa6   : > { %v384_v32 = vadd.f32 %v383_v26, %v344_v25  ;;  %v419_v43 = vsub.f32 %v387_v35, %v415_v36 }
  0xa8   : > { %v389_v40 = vmax.f32 %v384_v32, 0.0  ;;  %v423_v49 = vand.u32 2147483647, %v419_v43 }
  0xa9   : > { %v409_v20 = vpop.f32.mrf.mxu1 }
  0xaa   : > { %v410_v24 = vadd.f32 %v409_v20, %v339_v17  ;;  %v426_v51 = vpack.c.bf16 %v423_v49, %v422_v50 }
  0xac   : > { %v416_v33 = vmax.f32 %v410_v24, 0.0 }
  0xae   : > { %v420_v42 = vsub.f32 %v388_v31, %v416_v33 }
  0xb0   : > { %v424_v46 = vand.u32 2147483647, %v420_v42 }
  0xb1   : > { %v411_v34 = vpop.f32.mrf.mxu1 }
  0xb2   : > { %v412_v37 = vadd.f32 %v411_v34, %v344_v25 }
  0xb4   : > { %v417_v41 = vmax.f32 %v412_v37, 0.0 }
  0xb6   : > { %v421_v44 = vsub.f32 %v389_v40, %v417_v41 }
  0xb8   : > { %v425_v47 = vand.u32 2147483647, %v421_v44 }
  0xba   : > { %v427_v48 = vpack.c.bf16 %v425_v47, %v424_v46 }
  0xbc   : > { %444 = vmatpush.bf16.msra.mxu2 %v427_v48 }
  0xc0   : > { %445 = vmatpush.bf16.msra.mxu2 %v426_v51 }
  0xc3   : > { %579 = vmatmul.msk.bf16.vlgmr.msra.gmra.mxu2 %vm434_vm2, %v319_v52 }
 0x146   : > { %v447_v54 = vpop.f32.mrf.mxu2 }
 0x147   : > { %v448_v55 = vadd.f32 %v447_v54, %v432_v53 }
 0x149   : > { %451 = vst [vmem:[%s313_s14] sm:$0x3] %v448_v55 }
 0x14e   : > { %v449_v56 = vpop.f32.mrf.mxu2 }
 0x14f PF: > { %s16_s25 = sadd.s32 1, %s667_s25   ;;  %s794_s21 = smov %s659_s23 }
 0x150   : > { %p13_p7 = scmp.ge.s32.totalorder %s16_s25, 6   ;;  %s795_s22 = smov %s663_s24 }
 0x151   : > { %s796_s23 = smov %s799_s26  ;;  %s797_s24 = smov %s803_s27 }
 0x152   :  { %15 = sbr.rel (!%p13_p7) target bundleno = 3 (0x3), region = 77 }

</bundles_post_ra>
